<compile_context>
chip_gen: v6e
topology: v6e:2x2x1
jax: 0.10.0
libtpu: 0.0.40
codegen_flags: <defaults>
</compile_context>

<pallas_src>
import math

import jax
import jax.numpy as jnp
from jax import lax
from jax.experimental import pallas as pl
from jax.experimental.pallas import tpu as pltpu

_GELU_C = math.sqrt(2.0 / math.pi)
_LANE = 128


def _cdiv(a, b):
    return (a + b - 1) // b


def _round_up(x, m):
    return _cdiv(x, m) * m


def _pad2d(a, rows, cols):
    r, c = a.shape
    if r == rows and c == cols:
        return a
    return jnp.pad(a, ((0, rows - r), (0, cols - c)))


def _tpu_config():
    """Generation-aware defaults: (vmem_capacity_bytes, tile_n, max_tile_h)."""
    kind = ""
    try:
        kind = jax.devices()[0].device_kind.lower()
    except Exception:
        pass
    vmem_cap = None
    try:
        vmem_cap = int(pltpu.get_tpu_info().vmem_capacity_bytes)
    except Exception:
        pass
    if vmem_cap is None:
        vmem_cap = (64 << 20) if "v7" in kind else (128 << 20)

    if "v7" in kind or vmem_cap <= (64 << 20):
        # v7x: 64 MiB VMEM per TC.  tile_n=512 already sits past the ~310 FLOP/B
        # roofline knee; small hidden slices restore pipelining headroom.
        return vmem_cap, 512, 512
    if "v6" in kind:
        # v6e: 128 MiB VMEM; bigger row tiles cross the ~650-700 FLOP/B knee on
        # the re-streamed weights.
        return vmem_cap, 1024, 1024
    # v5e / unknown 128 MiB parts: 512 rows is already compute-bound.
    return vmem_cap, 512, 1024


def _vmem_estimate(tile_n, tile_h, dp, wbytes, xbytes, obytes, use_scratch):
    est = 2 * tile_n * dp * xbytes               # x tiles (double-buffered)
    est += 2 * tile_n * dp * obytes              # output tiles in out_dtype (double-buffered)
    est += 2 * 2 * tile_h * dp * wbytes          # W_fc + W_proj^T tiles (double-buffered)
    est += 2 * 8 * tile_h * 4 + 2 * 8 * dp * 4   # bias tiles (sublane-padded, f32)
    if use_scratch:
        est += tile_n * dp * 4                   # f32 accumulator scratch
    est += 2 * tile_n * tile_h * 4               # c_fc / GELU f32 staging
    est += tile_n * dp * 4                       # c_proj contribution staging
    return est


def _make_kernel(use_scratch):
    def kernel(x_ref, wfc_ref, bfc_ref, wproj_ref, bproj_ref, o_ref, *scratch):
        # x_ref:     [TILE_N, Dp]   row tile, resident across the k (hidden) axis
        # wfc_ref:   [TILE_H, Dp]   c_fc weight slice, PyTorch [out, in] layout
        # bfc_ref:   [1, TILE_H]    f32
        # wproj_ref: [TILE_H, Dp]   c_proj weight slice, pre-transposed to [H, D]
        # bproj_ref: [1, Dp]        f32
        # o_ref:     [TILE_N, Dp]   resident across k
        # scratch:   optional f32 accumulator (only when o_ref is not f32)
        acc_ref = scratch[0] if use_scratch else o_ref
        k = pl.program_id(1)

        # c_fc slice: x @ W_fc[k]^T -- contract the last dim of both operands
        # (same pattern Mosaic handles for flash-attention q@k^T), so W_fc keeps
        # its PyTorch layout and its DMA stays a contiguous row slab.
        h = lax.dot_general(
            x_ref[...], wfc_ref[...],
            dimension_numbers=(((1,), (1,)), ((), ())),
            preferred_element_type=jnp.float32,
        ) + bfc_ref[...]

        # NewGELU (tanh approximation), f32 on VPU/EUP.
        # h + 0.044715*h^3 == h * (1 + 0.044715*h^2) saves a vmul; tanh goes to
        # the EUP slot (effectively free next to the MXU).
        h2 = h * h
        h = 0.5 * h * (1.0 + jnp.tanh(_GELU_C * h * (1.0 + 0.044715 * h2)))

        # c_proj slice contribution: standard [M,K]@[K,N] on the MXU with the
        # pre-transposed weight; operands in compute dtype, f32 accumulation.
        contrib = jnp.dot(h.astype(wproj_ref.dtype), wproj_ref[...],
                          preferred_element_type=jnp.float32)

        @pl.when(k == 0)
        def _():
            # First hidden slice: write (contribution + bias) directly -- no
            # zero-init pass, no separate bias add at the flush.
            acc_ref[...] = contrib + bproj_ref[...]

        @pl.when(k > 0)
        def _():
            acc_ref[...] += contrib

        if use_scratch:
            @pl.when(k == pl.num_programs(1) - 1)
            def _():
                o_ref[...] = acc_ref[...].astype(o_ref.dtype)

        # TODO(synk): residual dropout is identity here (eval mode / p=0); a
        # training-mode dropout would use pltpu.prng_seed + pltpu.prng_random_bits.

    return kernel


def gpt_mlp(x, w_fc, b_fc, w_proj, b_proj, *, compute_dtype=jnp.bfloat16,
            tile_n=None, max_tile_h=None):
    """GPTMLP forward.

    x: [B, S, D].  w_fc: [H, D] (PyTorch layout), b_fc: [H],
    w_proj: [D, H] (PyTorch layout), b_proj: [D].
    compute_dtype: dtype of the MXU operands (default bf16; accumulation and
    GELU stay in f32).  Pass jnp.float32 (or None) for a full-precision path.
    """
    B, S, D = x.shape
    H = w_fc.shape[0]
    N = B * S
    out_dtype = x.dtype

    vmem_cap, tile_n_default, max_tile_h_default = _tpu_config()
    if tile_n is None:
        tile_n = tile_n_default
    if max_tile_h is None:
        max_tile_h = max_tile_h_default

    if compute_dtype is None:
        compute_dtype = x.dtype
    compute_dtype = jnp.dtype(compute_dtype)

    x = x.astype(compute_dtype)
    w_fc = w_fc.astype(compute_dtype)
    # One-time transpose of the c_proj weight to [H, D]: the second matmul is a
    # plain [M,K]@[K,N] and its per-k DMA a contiguous row slab.
    # TODO(synk): callers that own the parameters should store W_proj already
    # transposed to skip this per-call XLA transpose.
    w_proj_t = w_proj.astype(compute_dtype).T
    b_fc = b_fc.astype(jnp.float32)
    b_proj = b_proj.astype(jnp.float32)

    # f32 outputs accumulate directly in the resident output block (no scratch,
    # no final copy); narrower output dtypes keep an f32 accumulator scratch.
    use_scratch = out_dtype != jnp.float32

    # Sublane packing of the compute dtype: 8 rows/vreg (f32), 16 (bf16), 32 (8-bit).
    row_mult = max(8, 32 // compute_dtype.itemsize)

    Dp = _round_up(D, _LANE)

    # Megacore: keep the parallel row axis at >= 2 tiles whenever N allows it so
    # both TensorCores (v7x) get work on decode-sized batches.
    tile_n = max(row_mult, min(tile_n, _round_up(_cdiv(N, 2), row_mult)))
    tile_h = max(_LANE, min(_round_up(max_tile_h, _LANE), _round_up(H, _LANE)))

    wbytes = compute_dtype.itemsize
    xbytes = compute_dtype.itemsize
    obytes = jnp.dtype(out_dtype).itemsize

    # VMEM budget: physical capacity minus ~8 MiB headroom (56 MiB on v7x).
    budget = max(vmem_cap - (8 << 20), 24 << 20)
    while True:
        est = _vmem_estimate(tile_n, tile_h, Dp, wbytes, xbytes, obytes, use_scratch)
        if est <= budget or (tile_h <= _LANE and tile_n <= row_mult):
            break
        if tile_h > _LANE:
            tile_h = max(_LANE, _round_up(tile_h // 2, _LANE))
        else:
            tile_n = max(row_mult, _round_up(tile_n // 2, row_mult))

    Np = _round_up(N, tile_n)
    Hp = _round_up(H, tile_h)

    # Lane-dense zero padding.  Padded hidden columns are harmless: zero W_fc
    # rows + zero b_fc -> GELU(0)=0 -> zero contribution through zero W_proj rows.
    x2d = _pad2d(x.reshape(N, D), Np, Dp)
    wfc = _pad2d(w_fc, Hp, Dp)
    wproj = _pad2d(w_proj_t, Hp, Dp)
    bfc = _pad2d(b_fc.reshape(1, H), 1, Hp)
    bproj = _pad2d(b_proj.reshape(1, D), 1, Dp)

    grid = (Np // tile_n, Hp // tile_h)
    vmem_limit = int(min(budget, max(est + (8 << 20), 32 << 20)))

    scratch_shapes = [pltpu.VMEM((tile_n, Dp), jnp.float32)] if use_scratch else []

    out2d = pl.pallas_call(
        _make_kernel(use_scratch),
        out_shape=jax.ShapeDtypeStruct((Np, Dp), out_dtype),
        grid_spec=pltpu.PrefetchScalarGridSpec(
            num_scalar_prefetch=0,
            grid=grid,
            in_specs=[
                pl.BlockSpec((tile_n, Dp), lambda i, k: (i, 0)),   # x rows (resident over k)
                pl.BlockSpec((tile_h, Dp), lambda i, k: (k, 0)),   # W_fc slice [out, in]
                pl.BlockSpec((1, tile_h), lambda i, k: (0, k)),    # b_fc slice
                pl.BlockSpec((tile_h, Dp), lambda i, k: (k, 0)),   # W_proj^T slice [H, D]
                pl.BlockSpec((1, Dp), lambda i, k: (0, 0)),        # b_proj (resident)
            ],
            out_specs=pl.BlockSpec((tile_n, Dp), lambda i, k: (i, 0)),
            scratch_shapes=scratch_shapes,
        ),
        compiler_params=pltpu.CompilerParams(
            dimension_semantics=("parallel", "arbitrary"),
            vmem_limit_bytes=vmem_limit,
        ),
    )(x2d, wfc, bfc, wproj, bproj)

    return out2d[:N, :D].reshape(B, S, D)


def _init_linear(key, out_features, in_features, dtype=jnp.float32):
    """Deterministic nn.Linear-style init: U(-1/sqrt(fan_in), 1/sqrt(fan_in))."""
    k_w, k_b = jax.random.split(key)
    bound = 1.0 / math.sqrt(in_features)
    w = jax.random.uniform(k_w, (out_features, in_features), dtype,
                           minval=-bound, maxval=bound)
    b = jax.random.uniform(k_b, (out_features,), dtype, minval=-bound, maxval=bound)
    return w, b


def _reference(x, w_fc, b_fc, w_proj, b_proj):
    h = x @ w_fc.T + b_fc
    h = 0.5 * h * (1.0 + jnp.tanh(_GELU_C * (h + 0.044715 * h ** 3)))
    return h @ w_proj.T + b_proj


if __name__ == "__main__":
    # Small GPTConfig-consistent shapes: d_model=32, mlp_ratio=4, batch=2, seq=8.
    B, S, D, MLP_RATIO = 2, 8, 32, 4
    H = MLP_RATIO * D

    key = jax.random.PRNGKey(0)
    k_x, k_fc, k_proj = jax.random.split(key, 3)

    x = jax.random.normal(k_x, (B, S, D), jnp.float32)
    w_fc, b_fc = _init_linear(k_fc, H, D)
    w_proj, b_proj = _init_linear(k_proj, D, H)

    ref = _reference(x, w_fc, b_fc, w_proj, b_proj)

    # Full-precision MXU path (tight tolerance; exercises the scratch-free
    # accumulate-into-output variant).
    out_f32 = gpt_mlp(x, w_fc, b_fc, w_proj, b_proj, compute_dtype=jnp.float32)
    out_f32 = jax.block_until_ready(out_f32)
    assert out_f32.shape == (B, S, D)
    assert jnp.allclose(out_f32, ref, atol=2e-4, rtol=2e-4), "f32 mismatch vs reference"

    # Default path: bf16 MXU operands, f32 accumulation (recommended on v5e/v6e/v7x).
    out = gpt_mlp(x, w_fc, b_fc, w_proj, b_proj)
    out = jax.block_until_ready(out)
    assert out.shape == (B, S, D)
    assert jnp.allclose(out, ref, atol=5e-2, rtol=5e-2), "bf16 mismatch vs reference"

    print("KERNEL_OK")
</pallas_src>

<mosaic_0001>
module attributes {stable_mosaic.version = 11 : i64} {
  func.func @kernel(%arg0: i32, %arg1: i32, %arg2: memref<8x128xf32, #tpu.memory_space<vmem>>, %arg3: memref<128x128xf32, #tpu.memory_space<vmem>>, %arg4: memref<1x128xf32, #tpu.memory_space<vmem>>, %arg5: memref<128x128xf32, #tpu.memory_space<vmem>>, %arg6: memref<1x128xf32, #tpu.memory_space<vmem>>, %arg7: memref<8x128xf32, #tpu.memory_space<vmem>>) attributes {dimension_semantics = [#tpu.dimension_semantics<parallel>, #tpu.dimension_semantics<arbitrary>], iteration_bounds = array<i64: 2, 1>, scalar_prefetch = 0 : i64, scratch_operands = 0 : i64, tpu.core_type = #tpu.core_type<tc>, window_params = [{transform_indices = @transform_0, window_bounds = array<i64: 8, 128>}, {transform_indices = @transform_1, window_bounds = array<i64: 128, 128>}, {transform_indices = @transform_2, window_bounds = array<i64: 1, 128>}, {transform_indices = @transform_3, window_bounds = array<i64: 128, 128>}, {pipeline_mode = #tpu.pipeline_mode<synchronous>, transform_indices = @transform_4, window_bounds = array<i64: 1, 128>}, {transform_indices = @transform_5, window_bounds = array<i64: 8, 128>}]} {
    %c0 = arith.constant 0 : index
    %c0_0 = arith.constant 0 : index
    %0 = vector.load %arg2[%c0, %c0_0] : memref<8x128xf32, #tpu.memory_space<vmem>>, vector<8x128xf32>
    %c0_1 = arith.constant 0 : index
    %c0_2 = arith.constant 0 : index
    %1 = vector.load %arg3[%c0_1, %c0_2] : memref<128x128xf32, #tpu.memory_space<vmem>>, vector<128x128xf32>
    %cst = arith.constant dense<0.000000e+00> : vector<8x128xf32>
    %2 = tpu.matmul %0, %1, %cst {dimension_numbers = #tpu.dot_dimension_numbers<[1], [1], [0], [0], [0, 0, 1, 0], [], []>} : vector<8x128xf32>, vector<128x128xf32>, vector<8x128xf32> -> vector<8x128xf32>
    %c0_3 = arith.constant 0 : index
    %c0_4 = arith.constant 0 : index
    %3 = vector.load %arg4[%c0_3, %c0_4] : memref<1x128xf32, #tpu.memory_space<vmem>>, vector<1x128xf32>
    %4 = vector.broadcast %3 : vector<1x128xf32> to vector<8x128xf32>
    %5 = arith.addf %2, %4 : vector<8x128xf32>
    %6 = arith.mulf %5, %5 : vector<8x128xf32>
    %cst_5 = arith.constant 5.000000e-01 : f32
    %7 = vector.broadcast %cst_5 : f32 to vector<8x128xf32>
    %8 = arith.mulf %7, %5 : vector<8x128xf32>
    %cst_6 = arith.constant 0.797884583 : f32
    %9 = vector.broadcast %cst_6 : f32 to vector<8x128xf32>
    %10 = arith.mulf %9, %5 : vector<8x128xf32>
    %cst_7 = arith.constant 4.471500e-02 : f32
    %11 = vector.broadcast %cst_7 : f32 to vector<8x128xf32>
    %12 = arith.mulf %11, %6 : vector<8x128xf32>
    %cst_8 = arith.constant 1.000000e+00 : f32
    %13 = vector.broadcast %cst_8 : f32 to vector<8x128xf32>
    %14 = arith.addf %13, %12 : vector<8x128xf32>
    %15 = arith.mulf %10, %14 : vector<8x128xf32>
    %16 = math.tanh %15 : vector<8x128xf32>
    %cst_9 = arith.constant 1.000000e+00 : f32
    %17 = vector.broadcast %cst_9 : f32 to vector<8x128xf32>
    %18 = arith.addf %17, %16 : vector<8x128xf32>
    %19 = arith.mulf %8, %18 : vector<8x128xf32>
    %c0_10 = arith.constant 0 : index
    %c0_11 = arith.constant 0 : index
    %20 = vector.load %arg5[%c0_10, %c0_11] : memref<128x128xf32, #tpu.memory_space<vmem>>, vector<128x128xf32>
    %cst_12 = arith.constant dense<0.000000e+00> : vector<8x128xf32>
    %21 = tpu.matmul %19, %20, %cst_12 {dimension_numbers = #tpu.dot_dimension_numbers<[1], [0], [0], [1], [0, 0, 1, 1], [], []>} : vector<8x128xf32>, vector<128x128xf32>, vector<8x128xf32> -> vector<8x128xf32>
    %c0_i32 = arith.constant 0 : i32
    %22 = arith.cmpi eq, %arg1, %c0_i32 : i32
    %23 = arith.extui %22 : i1 to i32
    %c0_i32_13 = arith.constant 0 : i32
    %24 = arith.cmpi ne, %23, %c0_i32_13 : i32
    scf.if %24 {
      %c0_16 = arith.constant 0 : index
      %c0_17 = arith.constant 0 : index
      %28 = vector.load %arg6[%c0_16, %c0_17] : memref<1x128xf32, #tpu.memory_space<vmem>>, vector<1x128xf32>
      %29 = vector.broadcast %28 : vector<1x128xf32> to vector<8x128xf32>
      %30 = arith.addf %21, %29 : vector<8x128xf32>
      %c0_18 = arith.constant 0 : index
      %c0_19 = arith.constant 0 : index
      %31 = vector.load %arg7[%c0_18, %c0_19] : memref<8x128xf32, #tpu.memory_space<vmem>>, vector<8x128xf32>
      tpu.vector_store %arg7[%c0_18, %c0_19], %30 {strides = array<i32>} : memref<8x128xf32, #tpu.memory_space<vmem>>, vector<8x128xf32>,
    } else {
    }
    %c0_i32_14 = arith.constant 0 : i32
    %25 = arith.cmpi sgt, %arg1, %c0_i32_14 : i32
    %26 = arith.extui %25 : i1 to i32
    %c0_i32_15 = arith.constant 0 : i32
    %27 = arith.cmpi ne, %26, %c0_i32_15 : i32
    scf.if %27 {
      %c0_16 = arith.constant 0 : index
      %c0_17 = arith.constant 0 : index
      %28 = vector.load %arg7[%c0_16, %c0_17] : memref<8x128xf32, #tpu.memory_space<vmem>>, vector<8x128xf32>
      %29 = arith.addf %28, %21 : vector<8x128xf32>
      %c0_18 = arith.constant 0 : index
      %c0_19 = arith.constant 0 : index
      %30 = vector.load %arg7[%c0_18, %c0_19] : memref<8x128xf32, #tpu.memory_space<vmem>>, vector<8x128xf32>
      tpu.vector_store %arg7[%c0_18, %c0_19], %29 {strides = array<i32>} : memref<8x128xf32, #tpu.memory_space<vmem>>, vector<8x128xf32>,
    } else {
    }
    return
  }
  func.func @transform_0(%arg0: i32, %arg1: i32) -> (i32, i32) {
    %c0_i32 = arith.constant 0 : i32
    %c0_i32_0 = arith.constant 0 : i32
    return %arg0, %c0_i32 : i32, i32
  }
  func.func @transform_1(%arg0: i32, %arg1: i32) -> (i32, i32) {
    %c0_i32 = arith.constant 0 : i32
    %c0_i32_0 = arith.constant 0 : i32
    return %arg1, %c0_i32 : i32, i32
  }
  func.func @transform_2(%arg0: i32, %arg1: i32) -> (i32, i32) {
    %c0_i32 = arith.constant 0 : i32
    %c0_i32_0 = arith.constant 0 : i32
    return %c0_i32, %arg1 : i32, i32
  }
  func.func @transform_3(%arg0: i32, %arg1: i32) -> (i32, i32) {
    %c0_i32 = arith.constant 0 : i32
    %c0_i32_0 = arith.constant 0 : i32
    return %arg1, %c0_i32 : i32, i32
  }
  func.func @transform_4(%arg0: i32, %arg1: i32) -> (i32, i32) {
    %c0_i32 = arith.constant 0 : i32
    %c0_i32_0 = arith.constant 0 : i32
    %c0_i32_1 = arith.constant 0 : i32
    return %c0_i32, %c0_i32_0 : i32, i32
  }
  func.func @transform_5(%arg0: i32, %arg1: i32) -> (i32, i32) {
    %c0_i32 = arith.constant 0 : i32
    %c0_i32_0 = arith.constant 0 : i32
    return %arg0, %c0_i32 : i32, i32
  }
}

</mosaic_0001>

<bundles_post_ra>
// kernel: tpu_custom_call.1
= control target key start
LH: loop header
LB: loop body
LE: loop exit
PB: predicated region body
PF: predicated region fallthrough
CT: control target
= control target key end

     0   :  { %s1293_s0 = inlined_call_operand.hbm [shape: f32[16,128], index: 0, kind: input, shape index: {}]   ;;  %s1294_s1 = inlined_call_operand.hbm [shape: f32[128,128], index: 1, kind: input, shape index: {}]   ;;  %s1295_s2 = inlined_call_operand.vmem [shape: f32[1,128], index: 2, kind: input, shape index: {}]   ;;  %s1296_s3 = inlined_call_operand.hbm [shape: f32[128,128], index: 3, kind: input, shape index: {}]   ;;  %s1297_s4 = inlined_call_operand.vmem [shape: f32[1,128], index: 4, kind: input, shape index: {}]   ;;  %s1298_s5 = inlined_call_operand.hbm [shape: f32[16,128], index: 5, kind: output, shape index: {}]  }
   0x1   :  { %1302 = sst [smem:[#allocation12_spill]] %s1294_s1 }
   0x2   :  { %10 = vsyncpa [#allocation3], 0 }
   0x3   :  { %12 = vsyncpa [#allocation3 + $0x1], 0 }
   0x4   :  { %13 = vsyncpa [#allocation6], 0 }
   0x5   :  { %14 = vsyncpa [#allocation4], 0 }
   0x6   :  { %16 = vsyncpa [#allocation4 + $0x1], 0  ;;  %s1066_s18 = smov 0   ;;  %s1068_s19 = smov 0  }
   0x7   :  { %s1070_s20 = smov 0   ;;  %s1072_s21 = smov 0  }
   0x8   :  { %s1074_s22 = smov 0   ;;  %s1076_s23 = smov 0  }
   0x9 LB: > { %s649_s24 = sadd.s32 4294967295, %s1026_s23   ;;  %s650_s25 = sadd.s32 4294967294, %s1026_s23   ;;  %s1026_s23 = sphi %s1076_s23, %s22_s23   ;;  %s1022_s22 = sphi %s1074_s22, %s1320_s22   ;;  %s1018_s21 = sphi %s1072_s21, %s1319_s21   ;;  %s1014_s20 = sphi %s1070_s20, %s1318_s20   ;;  %s1010_s19 = sphi %s1068_s19, %s1317_s19   ;;  %s1006_s18 = sphi %s1066_s18, %s1316_s18  }
   0xa   : > { %p54_p0 = scmp.ne.s32.totalorder %s1010_s19, %s1006_s18  ;;  %p1100_p1 = scmp.eq.s32.totalorder %s649_s24, 0 }
   0xb   : > { %p1104_p2 = scmp.eq.s32.totalorder %s649_s24, 1  ;;  %p183_p3 = scmp.eq.s32.totalorder %s650_s25, 1 }
   0xc   : > { %s1303_s26 = scalar_select %p1100_p1, 1, 0 }
   0xd   : > { %p1110_p4 = por %p1100_p1, %p54_p0  ;;  %p651_p5 = scmp.ge.s32.totalorder %s1026_s23, 1 }
   0xe   : > { %p1115_p6 = por %p183_p3, %p54_p0  ;;  %p190_p7 = scmp.lt.s32.totalorder %s1026_s23, 3 }
   0xf   : > { %s1305_s28 = scalar_select %p1110_p4, 1, 0 }
  0x10   : > { %s1306_s29 = scalar_select %p1115_p6, 1, 0 }
  0x11   : > { %p1120_p8 = pnand %p651_p5, %p190_p7  ;;  %s1028_s6 = smov [#allocation5]  }
  0x12   : > { %s205_s7 = sshll.u32 %s1028_s6, 4  ;;  %s1029_s9 = smov [#allocation7]   ;;  %s206_s7 = int_to_ptr.vmem [resolvable:$true] %s205_s7 }
  0x13   : > { %p785_p9 = pneg %p1120_p8  ;;  %s227_s10 = sshll.u32 %s1029_s9, 4  ;;  %s228_s10 = int_to_ptr.vmem [resolvable:$true] %s227_s10 }
  0x14   : > { %s873_s11 = scalar_lea.vmem %s206_s7, 2048  ;;  %p881_p5 = scmp.lt.s32.totalorder %s206_s7, %s206_s7 }
  0x15   : > { %p1129_p11 = pnand %p785_p9, %p1100_p1  ;;  %p874_p13 = scmp.ne.s32.totalorder %s206_s7, %s873_s11 }
  0x16   : > { %p882_p7 = scmp.lt.s32.totalorder %s873_s11, %s873_s11 }
  0x17   : > { %p864_p12 = pneg %p1129_p11 }
  0x18   : > { %p883_p10 = por %p882_p7, %p881_p5 }
  0x19   : > { %p876_p0 = pnand %p874_p13, %p864_p12 }
  0x1b   : > { %p877_p3 = pneg %p876_p0 }
  0x1d   : > { %p884_p9 = pnand %p883_p10, %p877_p3 }
  0x1f   : > { %887 = shalt.err (!%p884_p9)
}
  0x20   : > { %s1030_s12 = smov 128   ;;  %s1031_s13 = smov 8  }
  0x21   : > { %s1309_s1 = sld [smem:[#allocation12_spill]]  ;;  %s899_s16 = scalar_lea.vmem %s228_s10, 2048 }
  0x22   : > { %p900_p6 = scmp.ne.s32.totalorder %s228_s10, %s899_s16  ;;  %p907_p1 = scmp.lt.s32.totalorder %s228_s10, %s228_s10 }
  0x23   : > { %p908_p4 = scmp.lt.s32.totalorder %s899_s16, %s899_s16 }
  0x24   : > { %p902_p13 = pnand %p900_p6, %p864_p12 }
  0x25   : > { %p909_p5 = por %p908_p4, %p907_p1 }
  0x26   : > { %p903_p0 = pneg %p902_p13 }
  0x27   : > { %788 = dma.hbm_to_vmem [thread:$0]  (!%p1129_p11), %s1309_s1, 2048, %s206_s7, [#allocation6], %s1030_s12, %s1030_s12, %s1031_s13  }
  0x28   : > { %p910_p10 = pnand %p909_p5, %p903_p0 }
  0x2a   : > { %913 = shalt.err (!%p910_p10)
}
  0x2b   : > { %791 = dma.hbm_to_vmem [thread:$0]  (!%p1129_p11), %s1296_s3, 2048, %s228_s10, [#allocation6], %s1030_s12, %s1030_s12, %s1031_s13  }
  0x2c   : > { %s34_s25 = sadd.s32 1, %s1022_s22  ;;  %s41_s6 = sadd.s32 1, %s1014_s20 }
  0x2d   : > { %p36_p1 = scmp.ge.s32.totalorder %s34_s25, 2  ;;  %p48_p4 = scmp.ne.s32.totalorder %s1014_s20, %s1010_s19 }
  0x2e   : > { %p49_p6 = scmp.eq.s32.totalorder %s1026_s23, 0  ;;  %p802_p12 = scmp.lt.s32.totalorder %s1026_s23, 2 }
  0x2f   : > { %s1322_s25 = smov (%p36_p1, %s34_s25), 0  ;;  %p1161_p7 = por %p1104_p2, %p48_p4 }
  0x30   : > { %p50_p3 = por %p49_p6, %p48_p4  ;;  %s38_s8 = ssub.s32 %s1022_s22, %s1322_s25 }
  0x31   : > { %s244_s9 = sand.u32 1, %s1014_s20   ;;  %p39_p9 = scmp.eq.s32.totalorder %s38_s8, 0 }
  0x32   : > { %s656_s10 = sshll.u32 %s244_s9, 3  ;;  %s657_s11 = sshll.u32 %s1022_s22, 7 }
  0x33   : > { %s1170_s12 = scalar_select %p39_p9, %s1014_s20, %s41_s6  }
  0x34   : > { %s253_s15 = scalar_lea.hbm %s1293_s0, %s657_s11  ;;  %s248_s16 = scalar_lea.vmem [#allocation2], %s656_s10 }
  0x35   : > { %s255_s17 = sshll.u32 %s248_s16, 4  ;;  %p1177_p11 = pnand %p802_p12, %p50_p3  ;;  %s256_s17 = int_to_ptr.vmem [resolvable:$true] %s255_s17 }
  0x36   : > { %s245_s24 = scalar_lea.sflag [#allocation3], %s244_s9  ;;  %s927_s8 = scalar_lea.vmem %s256_s17, 128 }
  0x37   : > { %p916_p2 = pneg %p1177_p11  ;;  %p928_p13 = scmp.ne.s32.totalorder %s256_s17, %s927_s8 }
  0x38   : > { %s1032_s6 = smov [#allocation2]  }
  0x39   : > { %p930_p0 = pnand %p928_p13, %p916_p2  ;;  %s932_s1 = sshll.u32 %s1032_s6, 4  ;;  %s933_s1 = int_to_ptr.vmem [resolvable:$false] %s932_s1 }
  0x3a   : > { %s934_s11 = scalar_lea.vmem %s933_s1, 256  ;;  %p935_p10 = scmp.lt.s32.totalorder %s256_s17, %s933_s1 }
  0x3b   : > { %p931_p5 = pneg %p930_p0  ;;  %p936_p1 = scmp.lt.s32.totalorder %s934_s11, %s927_s8 }
  0x3d   : > { %p937_p4 = por %p936_p1, %p935_p10 }
  0x3f   : > { %p938_p6 = pnand %p937_p4, %p931_p5 }
  0x41   : > { %941 = shalt.err (!%p938_p6)
}
  0x42   : > { %795 = dma.hbm_to_vmem [thread:$0]  (!%p1177_p11), %s253_s15, 128, %s256_s17, %s245_s24  }
  0x43   : > { %264 = sbr.rel (%p1120_p8) target bundleno = 571 (0x23b), region = 40  ;;  %s1188_s9 = sand.u32 (!%p1120_p8), 1, %s1010_s19  }
  0x44   : > { %s659_s10 = sshll.u32 (!%p1120_p8), %s1188_s9, 3  ;;  %s267_s13 = scalar_lea.sflag (!%p1120_p8), [#allocation3], %s1188_s9 }
  0x45   : > { %s1194_s1 = scalar_lea.vmem (!%p1120_p8), [#allocation2], %s659_s10  ;;  %p1312_p12 = scmp.ne.s32.totalorder (!%p1120_p8), %s1305_s28, 0 }
  0x48   : > { %993 = dma.done.wait (%p1312_p12), %s267_s13, 128  }
  0x49   : > { %995 = vsyncadd (%p1312_p12), %s267_s13, 4294967168  ;;  %p1313_p3 = scmp.ne.s32.totalorder %s1303_s26, 0 }
  0x4b   : > { %997 = dma.done.wait (%p1313_p3), [#allocation6], 4096  }
  0x4c   : > { %999 = vsyncadd (%p1313_p3), [#allocation6], 4294963200  ;;  %v1033_v0 = vmov 0.0   ;;  %vm1034_vm0 = vmmov 0   ;;  %v329_v1 = vld [vmem:[#allocation5 + $0x78] sm:$0xff]  ;;  %v328_v2 = vld [vmem:[#allocation5 + $0x70] sm:$0xff] }
  0x4d   : > { %703 = vmatprep.subr.mxu0 %v1033_v0  ;;  %735 = vmatprep.mubr.msk.f32.mxu0 %vm1034_vm0, %v1033_v0  ;;  %v431_v3 = vld [vmem:[#allocation7 + $0x78] sm:$0xff]  ;;  %v327_v4 = vld [vmem:[#allocation5 + $0x68] sm:$0xff]  ;;  %v326_v5 = vld [vmem:[#allocation5 + $0x60] sm:$0xff]  ;;  %s666_s15 = sshll.u32 %s1018_s21, 7  ;;  %s307_s16 = scalar_lea.vmem [#allocation8], %s659_s10 }
  0x4e   : > { %738 = vmatprep.subr.mxu1 %v1033_v0  ;;  %770 = vmatprep.mubr.msk.f32.mxu1 %vm1034_vm0, %v1033_v0  ;;  %v325_v6 = vld [vmem:[#allocation5 + $0x58] sm:$0xff]  ;;  %v324_v7 = vld [vmem:[#allocation5 + $0x50] sm:$0xff]  ;;  %v323_v8 = vld [vmem:[#allocation5 + $0x48] sm:$0xff]  ;;  %s536_s17 = sshll.u32 %s307_s16, 4  ;;  %s1251_s8 = scalar_lea.hbm %s1298_s5, %s666_s15  ;;  %s537_s17 = int_to_ptr.vmem [resolvable:$true] %s536_s17 }
  0x4f   : > { %704 = vmatpush3.xpose.msra.mxu0 %v329_v1  ;;  %739 = vmatpush3.msra.mxu1 %v431_v3  ;;  %v322_v9 = vld [vmem:[#allocation5 + $0x40] sm:$0xff]  ;;  %v321_v10 = vld [vmem:[#allocation5 + $0x38] sm:$0xff]  ;;  %v320_v11 = vld [vmem:[#allocation5 + $0x30] sm:$0xff]  ;;  %s523_s6 = scalar_lea.sflag [#allocation4], %s1188_s9  ;;  %s942_s11 = scalar_lea.vmem %s537_s17, 128 }
  0x50   : > { %705 = vmatprep.subr.mxu0 %v1033_v0  ;;  %740 = vmatprep.subr.mxu1 %v1033_v0  ;;  %v319_v12 = vld [vmem:[#allocation5 + $0x28] sm:$0xff]  ;;  %v318_v13 = vld [vmem:[#allocation5 + $0x20] sm:$0xff]  ;;  %v317_v14 = vld [vmem:[#allocation5 + $0x18] sm:$0xff]  ;;  %p943_p8 = scmp.ne.s32.totalorder %s537_s17, %s942_s11  ;;  %s1035_s21 = smov [#allocation8]  }
  0x51   : > { %v316_v15 = vld [vmem:[#allocation5 + $0x10] sm:$0xff]  ;;  %v315_v16 = vld [vmem:[#allocation5 + $0x8] sm:$0xff]  ;;  %v314_v17 = vld [vmem:[#allocation5] sm:$0xff]  ;;  %s946_s13 = sshll.u32 %s1035_s21, 4  ;;  %s947_s13 = int_to_ptr.vmem [resolvable:$false] %s946_s13 }
  0x52   : > { %v313_v18 = vld [vmem:[%s1194_s1] sm:$0xff]  ;;  %v429_v20 = vld [vmem:[#allocation7 + $0x68] sm:$0xff]  ;;  %v428_v21 = vld [vmem:[#allocation7 + $0x60] sm:$0xff]  ;;  %p944_p9 = pnand %p943_p8, %p1161_p7  ;;  %s948_s10 = scalar_lea.vmem %s947_s13, 256 }
  0x53   : > { %706 = vmatpush3.xpose.msra.mxu0 %v328_v2  ;;  %v430_v19 = vld [vmem:[#allocation7 + $0x70] sm:$0xff]  ;;  %v427_v22 = vld [vmem:[#allocation7 + $0x58] sm:$0xff]  ;;  %v425_v24 = vld [vmem:[#allocation7 + $0x48] sm:$0xff]  ;;  %p949_p2 = scmp.lt.s32.totalorder %s537_s17, %s947_s13  ;;  %p950_p13 = scmp.lt.s32.totalorder %s948_s10, %s942_s11 }
  0x54   : > { %707 = vmatprep.subr.mxu0 %v1033_v0  ;;  %741 = vmatpush3.msra.mxu1 %v430_v19  ;;  %v426_v23 = vld [vmem:[#allocation7 + $0x50] sm:$0xff]  ;;  %v424_v25 = vld [vmem:[#allocation7 + $0x40] sm:$0xff]  ;;  %v423_v26 = vld [vmem:[#allocation7 + $0x38] sm:$0xff]  ;;  %p945_p11 = pneg %p944_p9 }
  0x55   : > { %742 = vmatprep.subr.mxu1 %v1033_v0  ;;  %v422_v27 = vld [vmem:[#allocation7 + $0x30] sm:$0xff]  ;;  %v421_v28 = vld [vmem:[#allocation7 + $0x28] sm:$0xff]  ;;  %v420_v29 = vld [vmem:[#allocation7 + $0x20] sm:$0xff]  ;;  %p951_p0 = por %p950_p13, %p949_p2 }
  0x56   : > { %743 = vmatpush3.msra.mxu1 %v429_v20  ;;  %v419_v30 = vld [vmem:[#allocation7 + $0x18] sm:$0xff]  ;;  %v418_v31 = vld [vmem:[#allocation7 + $0x10] sm:$0xff]  ;;  %v417_v32 = vld [vmem:[#allocation7 + $0x8] sm:$0xff] }
  0x57   : > { %708 = vmatpush3.xpose.msra.mxu0 %v327_v4  ;;  %744 = vmatprep.subr.mxu1 %v1033_v0  ;;  %v416_v33 = vld [vmem:[#allocation7] sm:$0xff]  ;;  %v663_v34 = vld [vmem:[%s1295_s2] ss:$0 sm:$0xff]  ;;  %p952_p5 = pnand %p951_p0, %p945_p11 }
  0x58   : > { %709 = vmatprep.subr.mxu0 %v1033_v0  ;;  %745 = vmatpush3.msra.mxu1 %v428_v21  ;;  %v664_v47 = vld [vmem:[%s1297_s4] ss:$0 sm:$0xff] }
  0x59   : > { %746 = vmatprep.subr.mxu1 %v1033_v0 }
  0x5a   : > { %747 = vmatpush3.msra.mxu1 %v427_v22 }
  0x5b   : > { %710 = vmatpush3.xpose.msra.mxu0 %v326_v5  ;;  %748 = vmatprep.subr.mxu1 %v1033_v0 }
  0x5c   : > { %711 = vmatprep.subr.mxu0 %v1033_v0  ;;  %749 = vmatpush3.msra.mxu1 %v426_v23 }
  0x5d   : > { %750 = vmatprep.subr.mxu1 %v1033_v0 }
  0x5e   : > { %751 = vmatpush3.msra.mxu1 %v425_v24 }
  0x5f   : > { %712 = vmatpush3.xpose.msra.mxu0 %v325_v6  ;;  %752 = vmatprep.subr.mxu1 %v1033_v0 }
  0x60   : > { %713 = vmatprep.subr.mxu0 %v1033_v0  ;;  %753 = vmatpush3.msra.mxu1 %v424_v25 }
  0x61   : > { %754 = vmatprep.subr.mxu1 %v1033_v0 }
  0x62   : > { %755 = vmatpush3.msra.mxu1 %v423_v26 }
  0x63   : > { %714 = vmatpush3.xpose.msra.mxu0 %v324_v7  ;;  %756 = vmatprep.subr.mxu1 %v1033_v0 }
  0x64   : > { %715 = vmatprep.subr.mxu0 %v1033_v0  ;;  %757 = vmatpush3.msra.mxu1 %v422_v27 }
  0x65   : > { %758 = vmatprep.subr.mxu1 %v1033_v0 }
  0x66   : > { %759 = vmatpush3.msra.mxu1 %v421_v28 }
  0x67   : > { %716 = vmatpush3.xpose.msra.mxu0 %v323_v8  ;;  %760 = vmatprep.subr.mxu1 %v1033_v0 }
  0x68   : > { %717 = vmatprep.subr.mxu0 %v1033_v0  ;;  %761 = vmatpush3.msra.mxu1 %v420_v29 }
  0x69   : > { %762 = vmatprep.subr.mxu1 %v1033_v0 }
  0x6a   : > { %763 = vmatpush3.msra.mxu1 %v419_v30 }
  0x6b   : > { %718 = vmatpush3.xpose.msra.mxu0 %v322_v9  ;;  %764 = vmatprep.subr.mxu1 %v1033_v0 }
  0x6c   : > { %719 = vmatprep.subr.mxu0 %v1033_v0  ;;  %765 = vmatpush3.msra.mxu1 %v418_v31 }
  0x6d   : > { %766 = vmatprep.subr.mxu1 %v1033_v0 }
  0x6e   : > { %767 = vmatpush3.msra.mxu1 %v417_v32 }
  0x6f   : > { %720 = vmatpush3.xpose.msra.mxu0 %v321_v10  ;;  %768 = vmatprep.subr.mxu1 %v1033_v0 }
  0x70   : > { %721 = vmatprep.subr.mxu0 %v1033_v0  ;;  %769 = vmatpush3.msra.mxu1 %v416_v33 }
  0x73   : > { %722 = vmatpush3.xpose.msra.mxu0 %v320_v11 }
  0x74   : > { %723 = vmatprep.subr.mxu0 %v1033_v0 }
  0x77   : > { %724 = vmatpush3.xpose.msra.mxu0 %v319_v12 }
  0x78   : > { %725 = vmatprep.subr.mxu0 %v1033_v0 }
  0x7b   : > { %726 = vmatpush3.xpose.msra.mxu0 %v318_v13 }
  0x7c   : > { %727 = vmatprep.subr.mxu0 %v1033_v0 }
  0x7f   : > { %728 = vmatpush3.xpose.msra.mxu0 %v317_v14 }
  0x80   : > { %729 = vmatprep.subr.mxu0 %v1033_v0 }
  0x83   : > { %730 = vmatpush3.xpose.msra.mxu0 %v316_v15 }
  0x84   : > { %731 = vmatprep.subr.mxu0 %v1033_v0 }
  0x87   : > { %732 = vmatpush3.xpose.msra.mxu0 %v315_v16 }
  0x88   : > { %733 = vmatprep.subr.mxu0 %v1033_v0 }
  0x8b   : > { %734 = vmatpush3.xpose.msra.mxu0 %v314_v17 }
  0x8e   : > { %736 = vmatmul.mubr.f32.vlgmr.msra.gmra.mxu0 %v313_v18 }
 0x14e   : > { %v403_v35 = vpop.f32.mrf.mxu0 }
 0x14f   : > { %v404_v36 = vadd.f32 %v663_v34, %v403_v35 }
 0x150   : > { %v737_v37 = vpop.f32.mrf.mxu0 }
 0x151   : > { %v407_v38 = vmul.f32 %v404_v36, %v404_v36  ;;  %v409_v40 = vmul.f32 0.7978846, %v404_v36  ;;  %v408_v44 = vmul.f32 0.5, %v404_v36 }
 0x153   : > { %v410_v39 = vmul.f32 0.044715, %v407_v38 }
 0x155   : > { %v411_v41 = vadd.f32 1.0, %v410_v39 }
 0x157   : > { %v412_v42 = vmul.f32 %v411_v41, %v409_v40 }
 0x159   : > { %860 = vtanh.f32 %v412_v42 }
 0x166   : > { %v861_v43 = vpop.eup %860 }
 0x167   : > { %v414_v45 = vadd.f32 1.0, %v861_v43 }
 0x169   : > { %v415_v46 = vmul.f32 %v414_v45, %v408_v44 }
 0x16b   : > { %771 = vmatmul.mubr.f32.vlgmr.msra.gmra.mxu1 %v415_v46 }
 0x22b   : > { %v498_v48 = vpop.f32.mrf.mxu1 }
 0x22c   : > { %v513_v49 = vadd.f32 %v664_v47, %v498_v48 }
 0x22d   : > { %v772_v50 = vpop.f32.mrf.mxu1 }
 0x22e   : > { %514 = vst [vmem:[%s307_s16] sm:$0xff] %v513_v49 }
 0x22f   : > { %955 = shalt.err (!%p952_p5)
}
 0x230   : > { %s956_s1 = scalar_lea.hbm %s1251_s8, 128  ;;  %s960_s28 = scalar_lea.hbm %s1298_s5, 256 }
 0x231   : > { %p957_p10 = scmp.ne.s32.totalorder %s1251_s8, %s956_s1  ;;  %p961_p6 = scmp.lt.s32.totalorder %s1251_s8, %s1298_s5 }
 0x232   : > { %p962_p12 = scmp.lt.s32.totalorder %s960_s28, %s956_s1 }
 0x233   : > { %p958_p1 = pnand %p957_p10, %p1161_p7 }
 0x234   : > { %p963_p3 = por %p962_p12, %p961_p6 }
 0x235   : > { %p959_p4 = pneg %p958_p1 }
 0x237   : > { %p964_p8 = pnand %p963_p3, %p959_p4 }
 0x239   : > { %967 = shalt.err (!%p964_p8)
}
 0x23a   : > { %783 = dma.vmem_to_hbm [thread:$0]  (%p1161_p7), %s537_s17, 128, %s1251_s8, %s523_s6  }
 0x23b PF: > { %s548_s15 = sand.u32 1, %s1006_s18   ;;  %p1314_p9 = scmp.ne.s32.totalorder %s1306_s29, 0 }
 0x23c   : > { %p1315_p11 = scmp.ge.s32.totalorder %s1026_s23, 2  ;;  %s549_s16 = scalar_lea.sflag [#allocation4], %s548_s15 }
 0x23e   : > { %p797_p2 = pnand %p1315_p11, %p1314_p9 }
 0x240   : > { %p798_p13 = pneg %p797_p2 }
 0x242   : > { %1001 = dma.done.wait (%p798_p13), %s549_s16, 128  }
 0x243   : > { %1003 = vsyncadd (%p798_p13), %s549_s16, 4294967168  ;;  %s22_s23 = sadd.s32 1, %s1026_s23   ;;  %s1316_s18 = smov %s1010_s19 }
 0x244   : > { %p19_p0 = scmp.ge.s32.totalorder %s22_s23, 4   ;;  %s1317_s19 = smov %s1014_s20 }
 0x245   : > { %s1318_s20 = smov %s1170_s12  ;;  %s1319_s21 = smov %s1022_s22 }
 0x246   : > { %s1320_s22 = smov %s1322_s25  ;;  %21 = sbr.rel (!%p19_p0) target bundleno = 9 (0x9), region = 106 }
 0x24b   :  { %554 = vsyncpa [#allocation3], 1 }
 0x24c   :  { %556 = vsyncpa [#allocation3 + $0x1], 1 }
 0x24d   :  { %557 = vsyncpa [#allocation6], 1 }
 0x24e   :  { %558 = vsyncpa [#allocation4], 1 }
 0x24f   :  { %560 = vsyncpa [#allocation4 + $0x1], 1 }

</bundles_post_ra>
